<compile_context>
chip_gen: v6e
topology: v6e:2x2x1
jax: 0.10.0
libtpu: 0.0.40
codegen_flags: <defaults>
</compile_context>

<pallas_src>
import jax
import jax.numpy as jnp
from jax.experimental import pallas as pl
from jax.experimental.pallas import tpu as pltpu


def gfilter_kernel(x_ref, s_ref, h_ref, out_ref):
    """One batch element per grid step; Horner propagation + per-tap accumulate.

    x_ref  : (N, Fin)       this batch's node features (batch dim squeezed)
    s_ref  : (N, N)         graph shift operator (resident across grid steps)
    h_ref  : (K*Fin, Fout)  dense stack of filter taps H[k]
    out_ref: (N, Fout)      this batch's output slab
    """
    fin = x_ref.shape[1]                 # static
    k_taps = h_ref.shape[0] // fin       # static

    s = s_ref[...]
    z = x_ref[...]                       # z_0 = x[b]   (S^0 term)

    # k = 0 tap: acc = z_0 @ H[0]
    acc = jnp.dot(z, h_ref[0:fin, :], preferred_element_type=jnp.float32)

    # Horner: z_{k} = S @ z_{k-1}; accumulate z_k @ H[k].  No concat, no dead
    # final propagation, only {z, acc} live.
    for k in range(1, k_taps):
        z = jnp.dot(s, z, preferred_element_type=jnp.float32)
        acc = acc + jnp.dot(z, h_ref[k * fin:(k + 1) * fin, :],
                            preferred_element_type=jnp.float32)

    out_ref[...] = acc                   # single dense store, already f32


def gfilter_forward(x, S, H):
    """x: (B, N, Fin), S: (N, N), H: (K, Fin, Fout) -> (B, N, Fout), all f32."""
    B, N, Fin = x.shape
    K, _, Fout = H.shape

    x = x.astype(jnp.float32)
    S = S.astype(jnp.float32)
    Hstack = H.astype(jnp.float32).reshape(K * Fin, Fout)   # dense, no zeros

    # Honest FLOP count: per batch, (K-1) propagations + K tap contractions.
    flops = B * (2 * (K - 1) * N * N * Fin + 2 * K * N * Fin * Fout)
    bytes_accessed = 4 * (x.size + S.size + Hstack.size + B * N * Fout)

    return pl.pallas_call(
        gfilter_kernel,
        out_shape=jax.ShapeDtypeStruct((B, N, Fout), jnp.float32),
        grid=(B,),
        in_specs=[
            # batch dim squeezed out of the kernel view
            pl.BlockSpec((None, N, Fin), lambda b: (b, 0, 0)),
            # S / Hstack: constant block index -> DMA'd once, reused every step
            pl.BlockSpec((N, N), lambda b: (0, 0)),
            pl.BlockSpec((K * Fin, Fout), lambda b: (0, 0)),
        ],
        out_specs=pl.BlockSpec((None, N, Fout), lambda b: (b, 0, 0)),
        compiler_params=pltpu.CompilerParams(
            dimension_semantics=("parallel",)),       # megacore sharding on v7x
        cost_estimate=pl.CostEstimate(
            flops=flops, transcendentals=0, bytes_accessed=bytes_accessed),
    )(x, S, Hstack)


def gfilter_reference(x, S, H):
    """Pure-JAX reference (mirrors GFilter_func with torch.matrix_power)."""
    N = S.shape[0]
    out = jnp.zeros((x.shape[0], x.shape[1], H.shape[2]), jnp.float32)
    Sk = jnp.eye(N, dtype=jnp.float32)
    for k in range(H.shape[0]):
        out = out + jnp.einsum("ij,bjp,pq->biq", Sk, x, H[k])
        Sk = Sk @ S
    return out


if __name__ == "__main__":
    # Small shapes consistent with the module: K taps, Fin -> Fout features.
    # (Demo-sized only; see TODOs for realistic-N tiling guidance.)
    B, N, Fin, Fout, K = 2, 16, 8, 8, 3

    key = jax.random.PRNGKey(0)
    kx, ks, kh = jax.random.split(key, 3)
    x = jax.random.normal(kx, (B, N, Fin), dtype=jnp.float32)
    S = jax.random.normal(ks, (N, N), dtype=jnp.float32) / jnp.sqrt(N)
    # Deterministic init matching nn.Parameter(torch.randn(K, Fin, Fout) * 0.1)
    H = jax.random.normal(kh, (K, Fin, Fout), dtype=jnp.float32) * 0.1

    out = gfilter_forward(x, S, H)
    out = jax.block_until_ready(out)

    ref = gfilter_reference(x, S, H)
    assert out.shape == (B, N, Fout)
    assert jnp.allclose(out, ref, atol=1e-4, rtol=1e-4), (
        f"max abs err {jnp.max(jnp.abs(out - ref))}")

    print("KERNEL_OK")
</pallas_src>

<mosaic_0001>
module attributes {stable_mosaic.version = 11 : i64} {
  func.func @gfilter_kernel(%arg0: i32, %arg1: memref<1x16x8xf32, #tpu.memory_space<vmem>>, %arg2: memref<16x16xf32, #tpu.memory_space<vmem>>, %arg3: memref<24x8xf32, #tpu.memory_space<vmem>>, %arg4: memref<1x16x8xf32, #tpu.memory_space<vmem>>) attributes {dimension_semantics = [#tpu.dimension_semantics<parallel>], iteration_bounds = array<i64: 2>, scalar_prefetch = 0 : i64, scratch_operands = 0 : i64, tpu.core_type = #tpu.core_type<tc>, window_params = [{transform_indices = @transform_0, window_bounds = array<i64: 1, 16, 8>}, {pipeline_mode = #tpu.pipeline_mode<synchronous>, transform_indices = @transform_1, window_bounds = array<i64: 16, 16>}, {pipeline_mode = #tpu.pipeline_mode<synchronous>, transform_indices = @transform_2, window_bounds = array<i64: 24, 8>}, {transform_indices = @transform_3, window_bounds = array<i64: 1, 16, 8>}]} {
    %c0 = arith.constant 0 : index
    %c0_0 = arith.constant 0 : index
    %0 = vector.load %arg2[%c0, %c0_0] : memref<16x16xf32, #tpu.memory_space<vmem>>, vector<16x16xf32>
    %c0_1 = arith.constant 0 : index
    %c0_2 = arith.constant 0 : index
    %c0_3 = arith.constant 0 : index
    %1 = vector.load %arg1[%c0_1, %c0_2, %c0_3] : memref<1x16x8xf32, #tpu.memory_space<vmem>>, vector<1x16x8xf32>
    %2 = vector.shape_cast %1 : vector<1x16x8xf32> to vector<16x8xf32>
    %c0_4 = arith.constant 0 : index
    %c0_5 = arith.constant 0 : index
    %3 = vector.load %arg3[%c0_4, %c0_5] : memref<24x8xf32, #tpu.memory_space<vmem>>, vector<8x8xf32>
    %cst = arith.constant dense<0.000000e+00> : vector<16x8xf32>
    %4 = tpu.matmul %2, %3, %cst {dimension_numbers = #tpu.dot_dimension_numbers<[1], [0], [0], [1], [0, 0, 1, 1], [], []>} : vector<16x8xf32>, vector<8x8xf32>, vector<16x8xf32> -> vector<16x8xf32>
    %cst_6 = arith.constant dense<0.000000e+00> : vector<16x8xf32>
    %5 = tpu.matmul %0, %2, %cst_6 {dimension_numbers = #tpu.dot_dimension_numbers<[1], [0], [0], [1], [0, 0, 1, 1], [], []>} : vector<16x16xf32>, vector<16x8xf32>, vector<16x8xf32> -> vector<16x8xf32>
    %c8 = arith.constant 8 : index
    %c0_7 = arith.constant 0 : index
    %6 = vector.load %arg3[%c8, %c0_7] : memref<24x8xf32, #tpu.memory_space<vmem>>, vector<8x8xf32>
    %cst_8 = arith.constant dense<0.000000e+00> : vector<16x8xf32>
    %7 = tpu.matmul %5, %6, %cst_8 {dimension_numbers = #tpu.dot_dimension_numbers<[1], [0], [0], [1], [0, 0, 1, 1], [], []>} : vector<16x8xf32>, vector<8x8xf32>, vector<16x8xf32> -> vector<16x8xf32>
    %8 = arith.addf %4, %7 : vector<16x8xf32>
    %cst_9 = arith.constant dense<0.000000e+00> : vector<16x8xf32>
    %9 = tpu.matmul %0, %5, %cst_9 {dimension_numbers = #tpu.dot_dimension_numbers<[1], [0], [0], [1], [0, 0, 1, 1], [], []>} : vector<16x16xf32>, vector<16x8xf32>, vector<16x8xf32> -> vector<16x8xf32>
    %c16 = arith.constant 16 : index
    %c0_10 = arith.constant 0 : index
    %10 = vector.load %arg3[%c16, %c0_10] : memref<24x8xf32, #tpu.memory_space<vmem>>, vector<8x8xf32>
    %cst_11 = arith.constant dense<0.000000e+00> : vector<16x8xf32>
    %11 = tpu.matmul %9, %10, %cst_11 {dimension_numbers = #tpu.dot_dimension_numbers<[1], [0], [0], [1], [0, 0, 1, 1], [], []>} : vector<16x8xf32>, vector<8x8xf32>, vector<16x8xf32> -> vector<16x8xf32>
    %12 = arith.addf %8, %11 : vector<16x8xf32>
    %c0_12 = arith.constant 0 : index
    %c0_13 = arith.constant 0 : index
    %c0_14 = arith.constant 0 : index
    %13 = vector.load %arg4[%c0_12, %c0_13, %c0_14] : memref<1x16x8xf32, #tpu.memory_space<vmem>>, vector<1x16x8xf32>
    %14 = vector.shape_cast %13 : vector<1x16x8xf32> to vector<16x8xf32>
    %15 = vector.shape_cast %12 : vector<16x8xf32> to vector<1x16x8xf32>
    tpu.vector_store %arg4[%c0_12, %c0_13, %c0_14], %15 {strides = array<i32>} : memref<1x16x8xf32, #tpu.memory_space<vmem>>, vector<1x16x8xf32>,
    return
  }
  func.func @transform_0(%arg0: i32) -> (i32, i32, i32) {
    %c0_i32 = arith.constant 0 : i32
    %c0_i32_0 = arith.constant 0 : i32
    %c0_i32_1 = arith.constant 0 : i32
    return %arg0, %c0_i32, %c0_i32_0 : i32, i32, i32
  }
  func.func @transform_1(%arg0: i32) -> (i32, i32) {
    %c0_i32 = arith.constant 0 : i32
    %c0_i32_0 = arith.constant 0 : i32
    %c0_i32_1 = arith.constant 0 : i32
    return %c0_i32, %c0_i32_0 : i32, i32
  }
  func.func @transform_2(%arg0: i32) -> (i32, i32) {
    %c0_i32 = arith.constant 0 : i32
    %c0_i32_0 = arith.constant 0 : i32
    %c0_i32_1 = arith.constant 0 : i32
    return %c0_i32, %c0_i32_0 : i32, i32
  }
  func.func @transform_3(%arg0: i32) -> (i32, i32, i32) {
    %c0_i32 = arith.constant 0 : i32
    %c0_i32_0 = arith.constant 0 : i32
    %c0_i32_1 = arith.constant 0 : i32
    return %arg0, %c0_i32, %c0_i32_0 : i32, i32, i32
  }
}

</mosaic_0001>

<bundles_post_ra>
// kernel: tpu_custom_call.1
= control target key start
LH: loop header
LB: loop body
LE: loop exit
PB: predicated region body
PF: predicated region fallthrough
CT: control target
= control target key end

     0   :  { %s743_s12 = smov 0   ;;  %s794_s0 = inlined_call_operand.vmem [shape: f32[2,16,8], index: 0, kind: input, shape index: {}]   ;;  %s795_s1 = inlined_call_operand.vmem [shape: f32[16,16], index: 1, kind: input, shape index: {}]   ;;  %s796_s2 = inlined_call_operand.vmem [shape: f32[24,8], index: 2, kind: input, shape index: {}]   ;;  %s797_s3 = inlined_call_operand.vmem [shape: f32[2,16,8], index: 3, kind: output, shape index: {}]  }
   0x1 LB: > { %s638_s13 = sadd.s32 4294967295, %s721_s12   ;;  %p642_p0 = scmp.ge.s32.totalorder %s721_s12, 1  ;;  %s721_s12 = sphi %s743_s12, %s13_s12  }
   0x2   : > { %p137_p1 = scmp.lt.s32.totalorder %s721_s12, 3 }
   0x4   : > { %p138_p2 = pnand %p642_p0, %p137_p1 }
   0x5   : > { %p161_p3 = scmp.lt.s32.totalorder (!%p138_p2), %s638_s13, 1 }
   0x6   : > { %141 = sbr.rel (%p138_p2) target bundleno = 610 (0x262), region = 32 }
   0xb   : > { %v171_v0 = vld [vmem:[%s795_s1] sm:$0xff]  ;;  %vm176_vm0 = vcmask 130048   ;;  %s799_s13 = smov (!%p161_p3, %s638_s13), 1  ;;  %v172_v3 = vld [vmem:[%s795_s1 + $0x8] sm:$0xff]  ;;  %vm259_vm1 = vcmask 64512   ;;  %v497_v8 = vld [vmem:[%s796_s2 + $0x10] sm:$0xff] }
   0xc   : > { %682 = vmatprep.mubr.msk.f32.mxu0 %vm176_vm0, %v171_v0  ;;  %s659_s16 = sshll.u32 %s799_s13, 4  ;;  %v258_v4 = vld [vmem:[%s796_s2 + $0x8] sm:$0xff]  ;;  %v175_v5 = vld [vmem:[%s796_s2] sm:$0xff] }
   0xd   : > { %s165_s19 = scalar_lea.vmem %s794_s0, %s659_s16  ;;  %685 = vmatprep.subr.mxu1 %v258_v4  ;;  %s170_s30 = scalar_lea.vmem %s797_s3, %s659_s16 }
   0xe   : > { %v174_v1 = vld [vmem:[%s165_s19 + $0x8] sm:$0xff]  ;;  %v173_v2 = vld [vmem:[%s165_s19] sm:$0xff]  ;;  %686 = vmatpush3.msra.mxu1 %v258_v4 }
   0xf   : > { %678 = vmatprep.subr.mxu0 %v174_v1  ;;  %690 = vmatprep.subr.mxu1 %v175_v5 }
  0x10   : > { %679 = vmatpush3.msra.mxu0 %v174_v1 }
  0x11   : > { %680 = vmatprep.subr.mxu0 %v173_v2 }
  0x12   : > { %681 = vmatpush3.msra.mxu0 %v173_v2 }
  0x13   : > { %683 = vmatmul.mubr.msk.f32.vlgmr.msra.gmra.mxu0 %vm176_vm0, %v172_v3 }
  0x14   : > { %699 = vmatprep.mubr.msk.f32.mxu0 %vm176_vm0, %v171_v0 }
  0xd3   : > { %v684_v6 = vpop.f32.mrf.mxu0 }
  0xd4   : > { %695 = vmatprep.subr.mxu0 %v684_v6 }
  0xd5   : > { %v249_v7 = vpop.f32.mrf.mxu0  ;;  %696 = vmatpush3.msra.mxu0 %v684_v6 }
  0xd6   : > { %687 = vmatprep.mubr.msk.f32.mxu1 %vm259_vm1, %v249_v7  ;;  %697 = vmatprep.subr.mxu0 %v249_v7 }
  0xd7   : > { %688 = vmatmul.mubr.msk.f32.vlgmr.msra.gmra.mxu1 %vm259_vm1, %v684_v6  ;;  %698 = vmatpush3.msra.mxu0 %v249_v7 }
  0xd8   : > { %700 = vmatmul.mubr.msk.f32.vlgmr.msra.gmra.mxu0 %vm176_vm0, %v172_v3  ;;  %691 = vmatpush3.msra.mxu1 %v175_v5 }
  0xd9   : > { %692 = vmatprep.mubr.msk.f32.mxu1 %vm259_vm1, %v173_v2  ;;  %702 = vmatprep.subr.mxu1 %v497_v8 }
  0xdb   : > { %693 = vmatmul.mubr.msk.f32.vlgmr.msra.gmra.mxu1 %vm259_vm1, %v174_v1 }
  0xdc   : > { %703 = vmatpush3.msra.mxu1 %v497_v8 }
 0x197   : > { %v689_v11 = vpop.f32.mrf.mxu1 }
 0x198   : > { %v701_v9 = vpop.f32.mrf.mxu0 }
 0x199   : > { %v332_v12 = vpop.f32.mrf.mxu1 }
 0x19a   : > { %v488_v10 = vpop.f32.mrf.mxu0 }
 0x19b   : > { %704 = vmatprep.mubr.msk.f32.mxu1 %vm259_vm1, %v488_v10  ;;  %v694_v13 = vpop.f32.mrf.mxu1 }
 0x19c   : > { %705 = vmatmul.mubr.msk.f32.vlgmr.msra.gmra.mxu1 %vm259_vm1, %v701_v9  ;;  %v419_v15 = vadd.f32 %v694_v13, %v689_v11 }
 0x19d   : > { %v413_v14 = vpop.f32.mrf.mxu1 }
 0x19e   : > { %v414_v17 = vadd.f32 %v413_v14, %v332_v12 }
 0x25c   : > { %v706_v16 = vpop.f32.mrf.mxu1 }
 0x25d   : > { %v580_v18 = vadd.f32 %v706_v16, %v419_v15 }
 0x25e   : > { %v570_v19 = vpop.f32.mrf.mxu1 }
 0x25f   : > { %582 = vst.msk [vmem:[%s170_s30 + $0x8] sm:$0xff] %vm259_vm1, %v580_v18  ;;  %v579_v20 = vadd.f32 %v570_v19, %v414_v17 }
 0x261   : > { %581 = vst.msk [vmem:[%s170_s30] sm:$0xff] %vm259_vm1, %v579_v20 }
 0x262 PF: > { %s13_s12 = sadd.s32 1, %s721_s12  }
 0x263   : > { %p10_p4 = scmp.ge.s32.totalorder %s13_s12, 4  }
 0x265   :  { %12 = sbr.rel (!%p10_p4) target bundleno = 1 (0x1), region = 62 }

</bundles_post_ra>
